<compile_context>
chip_gen: v6e
topology: v6e:2x2x1
jax: 0.10.0
libtpu: 0.0.40
codegen_flags: <defaults>
</compile_context>

<pallas_src>
import jax
import jax.numpy as jnp
from jax.experimental import pallas as pl
from jax.experimental.pallas import tpu as pltpu

LN_EPS = 1e-5      # nn.LayerNorm default
_SUBLANE = 16      # bf16 sublane packing


# --------------------------------------------------------------------------- #
# Kernel
# --------------------------------------------------------------------------- #
def rate_embedding_kernel(x_ref, w1_ref, b1_ref, gamma_ref, beta_ref,
                          w2_ref, b2_ref, o_ref):
    # Single load of the streamed x tile; one upcast for the VPU/EUP path.
    x_lp = x_ref[...]                                   # (tile_b, H), bf16
    x_f32 = x_lp.astype(jnp.float32)

    # l_1_<emotion>(x) + x : MXU matmul, bf16 operands, f32 accumulation.
    h = jnp.dot(x_lp, w1_ref[...], preferred_element_type=jnp.float32)
    h = h + b1_ref[...] + x_f32

    # LayerNorm over the hidden axis: one-pass moments (both XLU reductions
    # issue back-to-back), all f32.
    mu = jnp.mean(h, axis=-1, keepdims=True)
    m2 = jnp.mean(h * h, axis=-1, keepdims=True)
    var = jnp.maximum(m2 - mu * mu, 0.0)
    ln = (h - mu) * jax.lax.rsqrt(var + LN_EPS)
    ln = ln * gamma_ref[...] + beta_ref[...]

    # dropout: eval-mode identity.
    # TODO(synk): training-mode dropout would use pltpu.prng_seed / prng_random_bits.
    act = jnp.maximum(ln, 0.0)

    # <emotion> head (hidden -> 1): W2 is passed as a (1, H) row, so this is a
    # VPU multiply + lane reduction instead of a nearly-empty MXU pass.
    logits = jnp.sum(act * w2_ref[...], axis=-1, keepdims=True) + b2_ref[0]
    o_ref[...] = jax.nn.sigmoid(logits).astype(o_ref.dtype)


# --------------------------------------------------------------------------- #
# pallas_call builder
# --------------------------------------------------------------------------- #
def _head_call(B_pad, H, tile_b):
    def const_spec(shape):
        return pl.BlockSpec(shape, lambda i: (0, 0))

    return pl.pallas_call(
        rate_embedding_kernel,
        out_shape=jax.ShapeDtypeStruct((B_pad, 1), jnp.float32),
        grid_spec=pltpu.PrefetchScalarGridSpec(
            num_scalar_prefetch=0,
            grid=(B_pad // tile_b,),
            in_specs=[
                pl.BlockSpec((tile_b, H), lambda i: (i, 0)),        # x (streamed)
                const_spec((H, H)),                                 # W1 (resident)
                const_spec((1, H)),                                 # b1
                const_spec((1, H)),                                 # gamma
                const_spec((1, H)),                                 # beta
                const_spec((1, H)),                                 # W2 row
                pl.BlockSpec(memory_space=pltpu.MemorySpace.SMEM),  # b2 scalar
            ],
            out_specs=pl.BlockSpec((tile_b, 1), lambda i: (i, 0)),
        ),
        compiler_params=pltpu.CompilerParams(
            dimension_semantics=("parallel",)),
    )


# --------------------------------------------------------------------------- #
# Tile selection (chip-aware)
# --------------------------------------------------------------------------- #
_TC_PER_CHIP = None


def _tensorcores_per_chip():
    """Best-effort count of TensorCores a single 'parallel' grid axis spans."""
    global _TC_PER_CHIP
    if _TC_PER_CHIP is None:
        cores = 1
        try:
            kind = jax.devices()[0].device_kind.lower()
            # v4 / v5p megacore and v7x expose 2 TensorCores per device that
            # the "parallel" grid axis shards across; v5e / v6e have one.
            if any(tag in kind for tag in ("v4", "v5p", "v7")):
                cores = 2
        except Exception:  # host-side query only; default to the safe value
            cores = 1
        _TC_PER_CHIP = cores
    return _TC_PER_CHIP


def _round_up(n, m):
    return ((n + m - 1) // m) * m


def _select_tile_b(B, requested):
    cores = _tensorcores_per_chip()
    cap = max(_SUBLANE,
              (min(requested, _round_up(B, _SUBLANE)) // _SUBLANE) * _SUBLANE)
    steps = pl.cdiv(B, cap)
    # On multi-core chips keep >= 2 pipelined steps per TensorCore (when the
    # batch is big enough) so each core overlaps its x-tile DMA with compute.
    # On single-core chips never split a fitting tile (pure step overhead).
    min_steps = 2 * cores if (cores > 1 and B >= 2 * cores * _SUBLANE) else 1
    steps = max(steps, min_steps)
    # Balance the tiles over the chosen step count to minimise padding.
    return max(_SUBLANE, _round_up(pl.cdiv(B, steps), _SUBLANE))


# --------------------------------------------------------------------------- #
# Wrapper
# --------------------------------------------------------------------------- #
def bert_regression_head(x, w1, b1, gamma, beta, w2, b2, *, tile_b=512,
                         mxu_dtype=jnp.bfloat16):
    """x: (B, H) pooled BERT embedding.  Returns sigmoid scores (B, 1), f32.

    Weight orientation contract: the kernel computes x @ W1, i.e. W1 is the
    *transpose* of PyTorch nn.Linear.weight; W2 is the (H, 1) / (H,) column of
    the final hidden->1 projection (also the transpose of its .weight).
    """
    B, H = x.shape
    w1 = jnp.asarray(w1)
    if w1.shape != (H, H):
        raise ValueError(f"w1 must be (H, H)=({H},{H}) (x @ W1), got {w1.shape}")
    w2_row = jnp.asarray(w2, jnp.float32).reshape(-1)
    if w2_row.shape[0] != H:
        raise ValueError(f"w2 must have {H} elements ((H,1) column), "
                         f"got shape {jnp.asarray(w2).shape}")
    for name, v in (("b1", b1), ("gamma", gamma), ("beta", beta)):
        if jnp.asarray(v).size != H:
            raise ValueError(f"{name} must have {H} elements")

    # ---- tile selection (bf16 sublane multiple, pad ragged batches) --------
    tile_b = _select_tile_b(B, tile_b)
    B_pad = pl.cdiv(B, tile_b) * tile_b

    # ---- operand layout -----------------------------------------------------
    lp = jnp.float32 if mxu_dtype is None else mxu_dtype
    x_lp = x.astype(lp)                 # x streamed in reduced precision
    if B_pad != B:
        x_lp = jnp.pad(x_lp, ((0, B_pad - B), (0, 0)))
    w1_lp = w1.astype(lp)
    b1_row = jnp.asarray(b1, jnp.float32).reshape(1, H)
    gamma_row = jnp.asarray(gamma, jnp.float32).reshape(1, H)
    beta_row = jnp.asarray(beta, jnp.float32).reshape(1, H)
    w2_row = w2_row.reshape(1, H)                        # (H,1) -> (1,H)
    b2_s = jnp.asarray(b2, jnp.float32).reshape(1)       # SMEM scalar

    out = _head_call(B_pad, H, tile_b)(
        x_lp, w1_lp, b1_row, gamma_row, beta_row, w2_row, b2_s)
    return out[:B]


# --------------------------------------------------------------------------- #
# Pure-JAX reference
# --------------------------------------------------------------------------- #
def reference_head(x, w1, b1, gamma, beta, w2, b2, mxu_dtype=None):
    """Pure-JAX reference.  If mxu_dtype is set, x/W1 are rounded to that dtype
    once (matmul and residual), matching the kernel's reduced-precision path."""
    if mxu_dtype is None:
        res = x
        h = x @ w1
    else:
        x_lp = x.astype(mxu_dtype)
        res = x_lp.astype(jnp.float32)
        h = jnp.dot(x_lp, w1.astype(mxu_dtype),
                    preferred_element_type=jnp.float32)
    h = h + b1.reshape(1, -1) + res
    mu = jnp.mean(h, axis=-1, keepdims=True)
    var = jnp.mean((h - mu) ** 2, axis=-1, keepdims=True)
    ln = (h - mu) / jnp.sqrt(var + LN_EPS)
    ln = ln * gamma.reshape(1, -1) + beta.reshape(1, -1)
    act = jnp.maximum(ln, 0.0)
    return jax.nn.sigmoid(act @ jnp.reshape(w2, (-1, 1)) + jnp.reshape(b2, (1, 1)))


# --------------------------------------------------------------------------- #
# Self-test
# --------------------------------------------------------------------------- #
if __name__ == "__main__":
    # Small shapes consistent with the module: pooled BERT output (batch, hidden).
    # Ragged batch (12) exercises the wrapper's pad-and-slice path.
    batch, hidden = 12, 128

    key = jax.random.PRNGKey(0)
    kx, kw1, kb1, kw2, kb2 = jax.random.split(key, 5)

    x = jax.random.normal(kx, (batch, hidden), dtype=jnp.float32)

    # nn.Linear-style init scales; nn.LayerNorm default weight/bias.
    s1 = 1.0 / jnp.sqrt(jnp.float32(hidden))
    w1 = jax.random.uniform(kw1, (hidden, hidden), jnp.float32, -s1, s1)
    b1 = jax.random.uniform(kb1, (hidden,), jnp.float32, -s1, s1)
    gamma = jnp.ones((hidden,), jnp.float32)
    beta = jnp.zeros((hidden,), jnp.float32)
    w2 = jax.random.uniform(kw2, (hidden, 1), jnp.float32, -s1, s1)
    b2 = jax.random.uniform(kb2, (1,), jnp.float32, -s1, s1)

    out = bert_regression_head(x, w1, b1, gamma, beta, w2, b2)
    out = jax.block_until_ready(out)
    assert out.shape == (batch, 1)

    # Tight check against a reference using the same bf16 x / bf16 W1 matmul.
    ref_bf16 = reference_head(x, w1, b1, gamma, beta, w2, b2,
                              mxu_dtype=jnp.bfloat16)
    assert jnp.allclose(out, ref_bf16, atol=2e-3, rtol=2e-3), \
        float(jnp.max(jnp.abs(out - ref_bf16)))

    # Looser sanity check against the pure-f32 module semantics.
    ref_f32 = reference_head(x, w1, b1, gamma, beta, w2, b2)
    assert jnp.allclose(out, ref_f32, atol=3e-2, rtol=3e-2), \
        float(jnp.max(jnp.abs(out - ref_f32)))

    print("KERNEL_OK")
</pallas_src>

<mosaic_0001>
module attributes {stable_mosaic.version = 11 : i64} {
  func.func @rate_embedding_kernel(%arg0: i32, %arg1: memref<16x128xbf16, #tpu.memory_space<vmem>>, %arg2: memref<128x128xbf16, #tpu.memory_space<vmem>>, %arg3: memref<1x128xf32, #tpu.memory_space<vmem>>, %arg4: memref<1x128xf32, #tpu.memory_space<vmem>>, %arg5: memref<1x128xf32, #tpu.memory_space<vmem>>, %arg6: memref<1x128xf32, #tpu.memory_space<vmem>>, %arg7: memref<1xf32, #tpu.memory_space<smem>>, %arg8: memref<16x1xf32, #tpu.memory_space<vmem>>) attributes {dimension_semantics = [#tpu.dimension_semantics<parallel>], iteration_bounds = array<i64: 1>, scalar_prefetch = 0 : i64, scratch_operands = 0 : i64, tpu.core_type = #tpu.core_type<tc>, window_params = [{transform_indices = @transform_0, window_bounds = array<i64: 16, 128>}, {pipeline_mode = #tpu.pipeline_mode<synchronous>, transform_indices = @transform_1, window_bounds = array<i64: 128, 128>}, {pipeline_mode = #tpu.pipeline_mode<synchronous>, transform_indices = @transform_2, window_bounds = array<i64: 1, 128>}, {pipeline_mode = #tpu.pipeline_mode<synchronous>, transform_indices = @transform_3, window_bounds = array<i64: 1, 128>}, {pipeline_mode = #tpu.pipeline_mode<synchronous>, transform_indices = @transform_4, window_bounds = array<i64: 1, 128>}, {pipeline_mode = #tpu.pipeline_mode<synchronous>, transform_indices = @transform_5, window_bounds = array<i64: 1, 128>}, {transform_indices = @transform_6, window_bounds = array<i64: 1>}, {transform_indices = @transform_7, window_bounds = array<i64: 16, 1>}]} {
    %c0 = arith.constant 0 : index
    %c0_0 = arith.constant 0 : index
    %0 = vector.load %arg1[%c0, %c0_0] : memref<16x128xbf16, #tpu.memory_space<vmem>>, vector<16x128xbf16>
    %1 = arith.extf %0 : vector<16x128xbf16> to vector<16x128xf32>
    %c0_1 = arith.constant 0 : index
    %c0_2 = arith.constant 0 : index
    %2 = vector.load %arg2[%c0_1, %c0_2] : memref<128x128xbf16, #tpu.memory_space<vmem>>, vector<128x128xbf16>
    %cst = arith.constant dense<0.000000e+00> : vector<16x128xf32>
    %3 = tpu.matmul %0, %2, %cst {dimension_numbers = #tpu.dot_dimension_numbers<[1], [0], [0], [1], [0, 0, 1, 1], [], []>} : vector<16x128xbf16>, vector<128x128xbf16>, vector<16x128xf32> -> vector<16x128xf32>
    %c0_3 = arith.constant 0 : index
    %c0_4 = arith.constant 0 : index
    %4 = vector.load %arg3[%c0_3, %c0_4] : memref<1x128xf32, #tpu.memory_space<vmem>>, vector<1x128xf32>
    %5 = vector.broadcast %4 : vector<1x128xf32> to vector<16x128xf32>
    %6 = arith.addf %3, %5 : vector<16x128xf32>
    %7 = arith.addf %6, %1 : vector<16x128xf32>
    %cst_5 = arith.constant dense<0.000000e+00> : vector<16xf32>
    %8 = vector.multi_reduction <add>, %7, %cst_5 [1] : vector<16x128xf32> to vector<16xf32>
    %9 = vector.shape_cast %8 : vector<16xf32> to vector<16x1xf32>
    %cst_6 = arith.constant 1.280000e+02 : f32
    %10 = vector.broadcast %cst_6 : f32 to vector<16x1xf32>
    %11 = arith.divf %9, %10 : vector<16x1xf32>
    %12 = arith.mulf %7, %7 : vector<16x128xf32>
    %cst_7 = arith.constant dense<0.000000e+00> : vector<16xf32>
    %13 = vector.multi_reduction <add>, %12, %cst_7 [1] : vector<16x128xf32> to vector<16xf32>
    %14 = vector.shape_cast %13 : vector<16xf32> to vector<16x1xf32>
    %cst_8 = arith.constant 1.280000e+02 : f32
    %15 = vector.broadcast %cst_8 : f32 to vector<16x1xf32>
    %16 = arith.divf %14, %15 : vector<16x1xf32>
    %17 = arith.mulf %11, %11 : vector<16x1xf32>
    %18 = arith.subf %16, %17 : vector<16x1xf32>
    %cst_9 = arith.constant 0.000000e+00 : f32
    %19 = vector.broadcast %cst_9 : f32 to vector<16x1xf32>
    %20 = arith.maximumf %18, %19 : vector<16x1xf32>
    %21 = vector.broadcast %11 : vector<16x1xf32> to vector<16x128xf32>
    %22 = arith.subf %7, %21 : vector<16x128xf32>
    %cst_10 = arith.constant 9.99999974E-6 : f32
    %23 = vector.broadcast %cst_10 : f32 to vector<16x1xf32>
    %24 = arith.addf %20, %23 : vector<16x1xf32>
    %25 = math.rsqrt %24 : vector<16x1xf32>
    %26 = vector.broadcast %25 : vector<16x1xf32> to vector<16x128xf32>
    %27 = arith.mulf %22, %26 : vector<16x128xf32>
    %c0_11 = arith.constant 0 : index
    %c0_12 = arith.constant 0 : index
    %28 = vector.load %arg4[%c0_11, %c0_12] : memref<1x128xf32, #tpu.memory_space<vmem>>, vector<1x128xf32>
    %29 = vector.broadcast %28 : vector<1x128xf32> to vector<16x128xf32>
    %30 = arith.mulf %27, %29 : vector<16x128xf32>
    %c0_13 = arith.constant 0 : index
    %c0_14 = arith.constant 0 : index
    %31 = vector.load %arg5[%c0_13, %c0_14] : memref<1x128xf32, #tpu.memory_space<vmem>>, vector<1x128xf32>
    %32 = vector.broadcast %31 : vector<1x128xf32> to vector<16x128xf32>
    %33 = arith.addf %30, %32 : vector<16x128xf32>
    %cst_15 = arith.constant 0.000000e+00 : f32
    %34 = vector.broadcast %cst_15 : f32 to vector<16x128xf32>
    %35 = arith.maximumf %33, %34 : vector<16x128xf32>
    %c0_16 = arith.constant 0 : index
    %c0_17 = arith.constant 0 : index
    %36 = vector.load %arg6[%c0_16, %c0_17] : memref<1x128xf32, #tpu.memory_space<vmem>>, vector<1x128xf32>
    %37 = vector.broadcast %36 : vector<1x128xf32> to vector<16x128xf32>
    %38 = arith.mulf %35, %37 : vector<16x128xf32>
    %cst_18 = arith.constant dense<0.000000e+00> : vector<16xf32>
    %39 = vector.multi_reduction <add>, %38, %cst_18 [1] : vector<16x128xf32> to vector<16xf32>
    %40 = vector.shape_cast %39 : vector<16xf32> to vector<16x1xf32>
    %c0_19 = arith.constant 0 : index
    %41 = memref.load %arg7[%c0_19] : memref<1xf32, #tpu.memory_space<smem>>
    %42 = vector.broadcast %41 : f32 to vector<16x1xf32>
    %43 = arith.addf %40, %42 : vector<16x1xf32>
    %44 = arith.negf %43 : vector<16x1xf32>
    %45 = math.exp %44 : vector<16x1xf32>
    %cst_20 = arith.constant 1.000000e+00 : f32
    %46 = vector.broadcast %cst_20 : f32 to vector<16x1xf32>
    %47 = arith.addf %46, %45 : vector<16x1xf32>
    %48 = arith.divf %46, %47 : vector<16x1xf32>
    %c0_21 = arith.constant 0 : index
    %c0_22 = arith.constant 0 : index
    %49 = vector.load %arg8[%c0_21, %c0_22] : memref<16x1xf32, #tpu.memory_space<vmem>>, vector<16x1xf32>
    tpu.vector_store %arg8[%c0_21, %c0_22], %48 {strides = array<i32>} : memref<16x1xf32, #tpu.memory_space<vmem>>, vector<16x1xf32>,
    return
  }
  func.func @transform_0(%arg0: i32) -> (i32, i32) {
    %c0_i32 = arith.constant 0 : i32
    %c0_i32_0 = arith.constant 0 : i32
    return %arg0, %c0_i32 : i32, i32
  }
  func.func @transform_1(%arg0: i32) -> (i32, i32) {
    %c0_i32 = arith.constant 0 : i32
    %c0_i32_0 = arith.constant 0 : i32
    %c0_i32_1 = arith.constant 0 : i32
    return %c0_i32, %c0_i32_0 : i32, i32
  }
  func.func @transform_2(%arg0: i32) -> (i32, i32) {
    %c0_i32 = arith.constant 0 : i32
    %c0_i32_0 = arith.constant 0 : i32
    %c0_i32_1 = arith.constant 0 : i32
    return %c0_i32, %c0_i32_0 : i32, i32
  }
  func.func @transform_3(%arg0: i32) -> (i32, i32) {
    %c0_i32 = arith.constant 0 : i32
    %c0_i32_0 = arith.constant 0 : i32
    %c0_i32_1 = arith.constant 0 : i32
    return %c0_i32, %c0_i32_0 : i32, i32
  }
  func.func @transform_4(%arg0: i32) -> (i32, i32) {
    %c0_i32 = arith.constant 0 : i32
    %c0_i32_0 = arith.constant 0 : i32
    %c0_i32_1 = arith.constant 0 : i32
    return %c0_i32, %c0_i32_0 : i32, i32
  }
  func.func @transform_5(%arg0: i32) -> (i32, i32) {
    %c0_i32 = arith.constant 0 : i32
    %c0_i32_0 = arith.constant 0 : i32
    %c0_i32_1 = arith.constant 0 : i32
    return %c0_i32, %c0_i32_0 : i32, i32
  }
  func.func @transform_6(%arg0: i32) -> i32 {
    %c0_i32 = arith.constant 0 : i32
    %c0_i32_0 = arith.constant 0 : i32
    return %c0_i32 : i32
  }
  func.func @transform_7(%arg0: i32) -> (i32, i32) {
    %c0_i32 = arith.constant 0 : i32
    %c0_i32_0 = arith.constant 0 : i32
    return %arg0, %c0_i32 : i32, i32
  }
}

</mosaic_0001>

<bundles_post_ra>
// kernel: tpu_custom_call.1
= control target key start
LH: loop header
LB: loop body
LE: loop exit
PB: predicated region body
PF: predicated region fallthrough
CT: control target
= control target key end

     0   :  { %13 = vsyncpa [#allocation4], 0  ;;  %s456_s0 = inlined_call_operand.hbm [shape: bf16[16,128], index: 0, kind: input, shape index: {}]   ;;  %s457_s1 = inlined_call_operand.hbm [shape: bf16[128,128], index: 1, kind: input, shape index: {}]   ;;  %s458_s2 = inlined_call_operand.vmem [shape: f32[1,128], index: 2, kind: input, shape index: {}]   ;;  %s459_s3 = inlined_call_operand.vmem [shape: f32[1,128], index: 3, kind: input, shape index: {}]   ;;  %s460_s4 = inlined_call_operand.vmem [shape: f32[1,128], index: 4, kind: input, shape index: {}]   ;;  %s461_s5 = inlined_call_operand.vmem [shape: f32[1,128], index: 5, kind: input, shape index: {}]   ;;  %s462_s6 = inlined_call_operand.<no memory space> [shape: f32[1], index: 6, kind: input, shape index: {}]   ;;  %s463_s7 = inlined_call_operand.vmem [shape: f32[16,1], index: 7, kind: output, shape index: {}]  }
   0x1   :  { %14 = vsyncpa [#allocation6], 0  ;;  %s383_s24 = smov [#allocation3]  }
   0x2   :  { %s20_s25 = sshll.u32 %s383_s24, 4  ;;  %s21_s25 = int_to_ptr.vmem [resolvable:$true] %s20_s25 }
   0x3   :  { %s347_s26 = scalar_lea.vmem %s21_s25, 128  ;;  %p352_p1 = scmp.lt.s32.totalorder %s21_s25, %s21_s25 }
   0x4   :  { %p348_p0 = scmp.ne.s32.totalorder %s21_s25, %s347_s26  ;;  %p353_p2 = scmp.lt.s32.totalorder %s347_s26, %s347_s26 }
   0x6   :  { %p354_p3 = por %p353_p2, %p352_p1 }
   0x8   :  { %p355_p4 = pnand %p354_p3, %p348_p0 }
   0xa   :  { %358 = shalt.err (!%p355_p4)
}
   0xb   :  { %s384_s27 = smov 64   ;;  %s385_s28 = smov 4  }
   0xc   :  { %26 = dma.hbm_to_vmem [thread:$0]  %s456_s0, 128, %s21_s25, [#allocation4], %s384_s27, %s384_s27, %s385_s28  }
   0xd   :  { %s386_s8 = smov [#allocation5]  }
   0xe   :  { %s32_s9 = sshll.u32 %s386_s8, 4  ;;  %s33_s9 = int_to_ptr.vmem [resolvable:$true] %s32_s9 }
   0xf   :  { %s367_s10 = scalar_lea.vmem %s33_s9, 1024  ;;  %p372_p6 = scmp.lt.s32.totalorder %s33_s9, %s33_s9 }
  0x10   :  { %p368_p5 = scmp.ne.s32.totalorder %s33_s9, %s367_s10  ;;  %p373_p7 = scmp.lt.s32.totalorder %s367_s10, %s367_s10 }
  0x12   :  { %p374_p8 = por %p373_p7, %p372_p6 }
  0x14   :  { %p375_p9 = pnand %p374_p8, %p368_p5 }
  0x16   :  { %378 = shalt.err (!%p375_p9)
}
  0x17   :  { %38 = dma.hbm_to_vmem [thread:$0]  %s457_s1, 1024, %s33_s9, [#allocation6], %s384_s27, %s384_s27, %s385_s28  }
  0x18   :  { %379 = dma.done.wait [#allocation4], 128  }
  0x19   :  { %380 = vsyncadd [#allocation4], 4294967168 }
  0x1a   :  { %381 = dma.done.wait [#allocation6], 1024  }
  0x1b   :  { %382 = vsyncadd [#allocation6], 4294966272  ;;  %v387_v0 = vmov 0.0   ;;  %vm388_vm0 = vmmov 0   ;;  %v317_v1 = vld [vmem:[#allocation5 + $0x38] sm:$0xff]   ;;  %v318_v2 = vld [vmem:[#allocation5 + $0x30] sm:$0xff]   ;;  %v243_v56 = vstv %s462_s6 }
  0x1c   :  { %291 = vmatprep.subr.bf16.mxu0 %v387_v0  ;;  %307 = vmatprep.mubr.msk.bf16.mxu0 %vm388_vm0, %v387_v0  ;;  %v319_v3 = vld [vmem:[#allocation5 + $0x28] sm:$0xff]   ;;  %v320_v4 = vld [vmem:[#allocation5 + $0x20] sm:$0xff]   ;;  %v321_v5 = vld [vmem:[#allocation5 + $0x18] sm:$0xff]   ;;  %vm258_vm1 = vcmask 7168  }
  0x1d   :  { %292 = vmatpush3.bf16.msra.mxu0 %v317_v1  ;;  %v322_v6 = vld [vmem:[#allocation5 + $0x10] sm:$0xff]   ;;  %v323_v7 = vld [vmem:[#allocation5 + $0x8] sm:$0xff]   ;;  %v324_v8 = vld [vmem:[#allocation5] sm:$0xff]  }
  0x1e   :  { %293 = vmatprep.subr.bf16.mxu0 %v387_v0  ;;  %v56_v9 = vld [vmem:[#allocation3] sm:$0xff]  }
  0x1f   :  { %v267_v10 = vld [vmem:[%s458_s2] ss:$0 sm:$0xff]  ;;  %v58_v11 = vunpack.c.l.bf16 %v56_v9  ;;  %v59_v16 = vunpack.c.h.bf16 %v56_v9 }
  0x20   :  { %v277_v41 = vld [vmem:[%s459_s3] ss:$0 sm:$0xff] }
  0x21   :  { %294 = vmatpush3.bf16.msra.mxu0 %v318_v2  ;;  %v278_v43 = vld [vmem:[%s460_s4] ss:$0 sm:$0xff] }
  0x22   :  { %295 = vmatprep.subr.bf16.mxu0 %v387_v0  ;;  %v279_v49 = vld [vmem:[%s461_s5] ss:$0 sm:$0xff] }
  0x25   :  { %296 = vmatpush3.bf16.msra.mxu0 %v319_v3 }
  0x26   :  { %297 = vmatprep.subr.bf16.mxu0 %v387_v0 }
  0x29   :  { %298 = vmatpush3.bf16.msra.mxu0 %v320_v4 }
  0x2a   :  { %299 = vmatprep.subr.bf16.mxu0 %v387_v0 }
  0x2d   :  { %300 = vmatpush3.bf16.msra.mxu0 %v321_v5 }
  0x2e   :  { %301 = vmatprep.subr.bf16.mxu0 %v387_v0 }
  0x31   :  { %302 = vmatpush3.bf16.msra.mxu0 %v322_v6 }
  0x32   :  { %303 = vmatprep.subr.bf16.mxu0 %v387_v0 }
  0x35   :  { %304 = vmatpush3.bf16.msra.mxu0 %v323_v7 }
  0x36   :  { %305 = vmatprep.subr.bf16.mxu0 %v387_v0 }
  0x39   :  { %306 = vmatpush3.bf16.msra.mxu0 %v324_v8 }
  0x3c   :  { %308 = vmatmul.mubr.bf16.vlgmr.msra.gmra.mxu0 %v56_v9 }
  0xfc   :  { %v171_v12 = vpop.f32.mrf.mxu0 }
  0xfd   :  { %v172_v13 = vadd.f32 %v267_v10, %v171_v12 }
  0xfe   :  { %v309_v14 = vpop.f32.mrf.mxu0 }
  0xff   :  { %v178_v15 = vadd.f32 %v172_v13, %v58_v11 }
 0x100   :  { %v174_v17 = vpop.f32.mrf.mxu0 }
 0x101   :  { %v175_v18 = vadd.f32 %v267_v10, %v174_v17  ;;  %180 = vadd.xlane.f32.xlu0 %v178_v15  ;;  %v187_v19 = vmul.f32 %v178_v15, %v178_v15 }
 0x102   :  { %v310_v20 = vpop.f32.mrf.mxu0 }
 0x103   :  { %v179_v21 = vadd.f32 %v175_v18, %v59_v16  ;;  %189 = vadd.xlane.f32.xlu1 %v187_v19 }
 0x105   :  { %182 = vadd.xlane.f32.xlu0 %v179_v21  ;;  %v188_v22 = vmul.f32 %v179_v21, %v179_v21 }
 0x107   :  { %191 = vadd.xlane.f32.xlu1 %v188_v22 }
 0x18a   :  { %v181_v23 = vpop.xlane.xlu0 %180 }
 0x18b   :  { %v185_v24 = vmul.f32 0.0078125, %v181_v23 }
 0x18c   :  { %v190_v25 = vpop.xlane.xlu1 %189 }
 0x18d   :  { %v195_v26 = vmul.f32 %v185_v24, %v185_v24  ;;  %v193_v27 = vmul.f32 0.0078125, %v190_v25  ;;  %v201_v39 = vsub.f32 %v178_v15, %v185_v24 }
 0x18e   :  { %v183_v28 = vpop.xlane.xlu0 %182 }
 0x18f   :  { %v197_v29 = vsub.f32 %v193_v27, %v195_v26  ;;  %v186_v30 = vmul.f32 0.0078125, %v183_v28 }
 0x190   :  { %v192_v31 = vpop.xlane.xlu1 %191 }
 0x191   :  { %v199_v32 = vmax.f32 %v197_v29, 0.0  ;;  %v196_v33 = vmul.f32 %v186_v30, %v186_v30  ;;  %v194_v34 = vmul.f32 0.0078125, %v192_v31  ;;  %v202_v44 = vsub.f32 %v179_v21, %v186_v30 }
 0x193   :  { %v203_v35 = vadd.f32 1e-05, %v199_v32  ;;  %v198_v36 = vsub.f32 %v194_v34, %v196_v33 }
 0x195   :  { %327 = vrsqrt.f32 %v203_v35  ;;  %v200_v37 = vmax.f32 %v198_v36, 0.0 }
 0x197   :  { %v204_v38 = vadd.f32 1e-05, %v200_v37 }
 0x199   :  { %329 = vrsqrt.f32 %v204_v38 }
 0x1a2   :  { %v328_v40 = vpop.eup %327 }
 0x1a3   :  { %v207_v42 = vmul.f32 %v328_v40, %v201_v39 }
 0x1a5   :  { %v216_v45 = vmul.f32 %v277_v41, %v207_v42 }
 0x1a6   :  { %v330_v46 = vpop.eup %329 }
 0x1a7   :  { %v225_v47 = vadd.f32 %v278_v43, %v216_v45  ;;  %v208_v48 = vmul.f32 %v330_v46, %v202_v44 }
 0x1a9   :  { %v227_v50 = vmax.f32 %v225_v47, 0.0  ;;  %v217_v51 = vmul.f32 %v277_v41, %v208_v48 }
 0x1ab   :  { %v236_v52 = vmul.f32 %v279_v49, %v227_v50  ;;  %v226_v53 = vadd.f32 %v278_v43, %v217_v51 }
 0x1ad   :  { %238 = vadd.xlane.f32.xlu0 %v236_v52  ;;  %v228_v54 = vmax.f32 %v226_v53, 0.0 }
 0x1af   :  { %v237_v55 = vmul.f32 %v279_v49, %v228_v54 }
 0x1b1   :  { %240 = vadd.xlane.f32.xlu1 %v237_v55 }
 0x236   :  { %v239_v57 = vpop.xlane.xlu0 %238 }
 0x237   :  { %v244_v58 = vadd.f32 %v243_v56, %v239_v57 }
 0x239   :  { %v280_v59 = vmul.f32 -1.442695, %v244_v58 }
 0x23a   :  { %v241_v60 = vpop.xlane.xlu1 %240 }
 0x23b   :  { %331 = vpow2.f32 %v280_v59  ;;  %v245_v61 = vadd.f32 %v243_v56, %v241_v60 }
 0x23d   :  { %v281_v62 = vmul.f32 -1.442695, %v245_v61 }
 0x23f   :  { %333 = vpow2.f32 %v281_v62 }
 0x248   :  { %v332_v63 = vpop.eup %331 }
 0x249   :  { %v252_v0 = vadd.f32 1.0, %v332_v63 }
 0x24b   :  { %335 = vrcp.f32 %v252_v0 }
 0x24c   :  { %v334_v1 = vpop.eup %333 }
 0x24d   :  { %v253_v2 = vadd.f32 1.0, %v334_v1 }
 0x24f   :  { %337 = vrcp.f32 %v253_v2 }
 0x258   :  { %v336_v3 = vpop.eup %335 }
 0x259   :  { %259 = vst.msk [vmem:[%s463_s7] sm:$0xff] %vm258_vm1, %v336_v3 }
 0x25c   :  { %v338_v4 = vpop.eup %337 }
 0x25d   :  { %260 = vst.msk [vmem:[%s463_s7 + $0x8] sm:$0xff] %vm258_vm1, %v338_v4 }
 0x25e   :  { %265 = vsyncpa [#allocation4], 1 }
 0x25f   :  { %266 = vsyncpa [#allocation6], 1 }

</bundles_post_ra>
